<compile_context>
chip_gen: v7x
topology: tpu7x:2x2x1
jax: 0.10.0
libtpu: 0.0.40
codegen_flags: <defaults>
</compile_context>

<pallas_src>
import jax
import jax.numpy as jnp
from jax.experimental import pallas as pl
from jax.experimental.pallas import tpu as pltpu

_MAX_DMA_CHUNKS = 8  # outstanding HBM->HBM DMAs (4-8 is plenty to saturate)


def _chunk_rows(num_rows, itemsize):
    """Static (start, rows) chunks of a (num_rows, 128) slab.

    Chunk starts are aligned to the dtype's sublane tile (8 rows for f32,
    16 for bf16, 32 for int8) so each DMA except the tail begins on an HBM
    tile boundary.  Only the final chunk may be clamped short.
    """
    row_align = max(1, 32 // itemsize)                 # rows per sublane tile
    groups = -(-num_rows // row_align)                 # cdiv
    num_chunks = max(1, min(_MAX_DMA_CHUNKS, groups))
    base, rem = divmod(groups, num_chunks)
    chunks = []
    start = 0
    for i in range(num_chunks):
        g = base + (1 if i < rem else 0)
        rows = min(g * row_align, num_rows - start)
        chunks.append((start, rows))
        start += rows
    return chunks


def _make_dma_copy_kernel(chunks):
    """Kernel: chunked HBM->HBM async copies, all outstanding, then wait."""

    def kernel(x_ref, o_ref, sems):
        copies = []
        for idx, (start, rows) in enumerate(chunks):
            cp = pltpu.make_async_copy(
                x_ref.at[pl.ds(start, rows)],
                o_ref.at[pl.ds(start, rows)],
                sems.at[idx],
            )
            cp.start()
            copies.append(cp)
        for cp in copies:
            cp.wait()

    return kernel


def _dma_copy_2d(flat2d):
    r, c = flat2d.shape
    itemsize = jnp.dtype(flat2d.dtype).itemsize
    total_bytes = r * c * itemsize
    chunks = _chunk_rows(r, itemsize)
    return pl.pallas_call(
        _make_dma_copy_kernel(chunks),
        out_shape=jax.ShapeDtypeStruct((r, c), flat2d.dtype),
        in_specs=[pl.BlockSpec(memory_space=pl.ANY)],
        out_specs=pl.BlockSpec(memory_space=pl.ANY),
        scratch_shapes=[pltpu.SemaphoreType.DMA((len(chunks),))],
        compiler_params=pltpu.CompilerParams(has_side_effects=True),
        cost_estimate=pl.CostEstimate(
            flops=0, transcendentals=0, bytes_accessed=2 * total_bytes),
    )(flat2d)


def flatten(x):
    """Pallas equivalent of torch's x.view(x.size(0), -1)."""
    n = x.shape[0]
    d = 1
    for s in x.shape[1:]:
        d *= s
    total = n * d

    if total == 0 or total % 128 != 0:
        # Lane-unaligned (or empty) total: a Pallas copy would need masked
        # lane-tail stores / unbounded (1, d) blocks; the XLA reshape is
        # metadata-only and strictly faster/safer.
        # TODO(synk): route a 128-aligned main chunk through the DMA kernel
        # plus a tiny tail if huge unaligned feature dims ever show up here.
        return x.reshape(n, d)

    # Retile the contiguous buffer as (R, 128): any contiguous 2-D retiling
    # preserves row-major order, and the DMA engines do not care about lane
    # or sublane density, so the simplest lane-width shape always works.
    r = total // 128
    flat = x.reshape(r, 128)
    out = _dma_copy_2d(flat)
    return out.reshape(n, d)  # metadata-only


if __name__ == "__main__":
    key = jax.random.PRNGKey(0)

    # Primary test: NCHW conv feature map, batch=2, C=4, H=W=16.
    x = jax.random.normal(key, (2, 4, 16, 16), dtype=jnp.float32)
    y = flatten(x)
    jax.block_until_ready(y)
    y_ref = x.reshape(x.shape[0], -1)
    assert y.shape == (2, 4 * 16 * 16), y.shape
    assert y.dtype == x.dtype
    assert jnp.array_equal(y, y_ref), "Flatten mismatch (aligned path)"

    # Uneven DMA chunking: total = 128 * 13 lanes-rows -> clamped tail chunk.
    x2 = jax.random.normal(jax.random.PRNGKey(1), (2, 13, 64), dtype=jnp.float32)
    y2 = flatten(x2)
    jax.block_until_ready(y2)
    assert jnp.array_equal(y2, x2.reshape(2, -1)), "Flatten mismatch (uneven chunks)"

    # Non-128-aligned total exercises the metadata-only fallback.
    x3 = jax.random.normal(jax.random.PRNGKey(2), (2, 3, 5, 7), dtype=jnp.float32)
    y3 = flatten(x3)
    jax.block_until_ready(y3)
    assert jnp.array_equal(y3, x3.reshape(2, -1)), "Flatten mismatch (fallback path)"

    print("KERNEL_OK")
</pallas_src>

<mosaic_0001>
module attributes {stable_mosaic.version = 11 : i64} {
  func.func @kernel(%arg0: memref<16x128xf32, #tpu.memory_space<any>>, %arg1: memref<16x128xf32, #tpu.memory_space<any>>, %arg2: memref<2x!tpu.dma_semaphore, #tpu.memory_space<semaphore_mem>>) attributes {dimension_semantics = [], scalar_prefetch = 0 : i64, scratch_operands = 1 : i64, tpu.core_type = #tpu.core_type<tc>} {
    %c0_i32 = arith.constant 0 : i32
    %c0_i32_0 = arith.constant 0 : i32
    %c0_i32_1 = arith.constant 0 : i32
    %0 = tpu.memref_slice %arg0[%c0_i32_0, %c0_i32_1] : memref<16x128xf32, #tpu.memory_space<any>> -> memref<8x128xf32, #tpu.memory_space<any>>
    %c0_i32_2 = arith.constant 0 : i32
    %c0_i32_3 = arith.constant 0 : i32
    %1 = tpu.memref_slice %arg1[%c0_i32_2, %c0_i32_3] : memref<16x128xf32, #tpu.memory_space<any>> -> memref<8x128xf32, #tpu.memory_space<any>>
    %2 = tpu.memref_slice %arg2[%c0_i32] : memref<2x!tpu.dma_semaphore, #tpu.memory_space<semaphore_mem>> -> memref<1x!tpu.dma_semaphore, #tpu.memory_space<semaphore_mem>>
    %3 = tpu.memref_squeeze %2 : memref<1x!tpu.dma_semaphore, #tpu.memory_space<semaphore_mem>> -> memref<!tpu.dma_semaphore, #tpu.memory_space<semaphore_mem>>
    tpu.enqueue_dma source(%0 : memref<8x128xf32, #tpu.memory_space<any>>) target(%1 : memref<8x128xf32, #tpu.memory_space<any>>) target_semaphore(%3 : memref<!tpu.dma_semaphore, #tpu.memory_space<semaphore_mem>>)
    %c1_i32 = arith.constant 1 : i32
    %c8_i32 = arith.constant 8 : i32
    %c0_i32_4 = arith.constant 0 : i32
    %4 = tpu.memref_slice %arg0[%c8_i32, %c0_i32_4] : memref<16x128xf32, #tpu.memory_space<any>> -> memref<8x128xf32, #tpu.memory_space<any>>
    %c8_i32_5 = arith.constant 8 : i32
    %c0_i32_6 = arith.constant 0 : i32
    %5 = tpu.memref_slice %arg1[%c8_i32_5, %c0_i32_6] : memref<16x128xf32, #tpu.memory_space<any>> -> memref<8x128xf32, #tpu.memory_space<any>>
    %6 = tpu.memref_slice %arg2[%c1_i32] : memref<2x!tpu.dma_semaphore, #tpu.memory_space<semaphore_mem>> -> memref<1x!tpu.dma_semaphore, #tpu.memory_space<semaphore_mem>>
    %7 = tpu.memref_squeeze %6 : memref<1x!tpu.dma_semaphore, #tpu.memory_space<semaphore_mem>> -> memref<!tpu.dma_semaphore, #tpu.memory_space<semaphore_mem>>
    tpu.enqueue_dma source(%4 : memref<8x128xf32, #tpu.memory_space<any>>) target(%5 : memref<8x128xf32, #tpu.memory_space<any>>) target_semaphore(%7 : memref<!tpu.dma_semaphore, #tpu.memory_space<semaphore_mem>>)
    %c0_i32_7 = arith.constant 0 : i32
    %c0_i32_8 = arith.constant 0 : i32
    %c0_i32_9 = arith.constant 0 : i32
    %8 = tpu.memref_slice %arg0[%c0_i32_8, %c0_i32_9] : memref<16x128xf32, #tpu.memory_space<any>> -> memref<8x128xf32, #tpu.memory_space<any>>
    %c0_i32_10 = arith.constant 0 : i32
    %c0_i32_11 = arith.constant 0 : i32
    %9 = tpu.memref_slice %arg1[%c0_i32_10, %c0_i32_11] : memref<16x128xf32, #tpu.memory_space<any>> -> memref<8x128xf32, #tpu.memory_space<any>>
    %10 = tpu.memref_slice %arg2[%c0_i32_7] : memref<2x!tpu.dma_semaphore, #tpu.memory_space<semaphore_mem>> -> memref<1x!tpu.dma_semaphore, #tpu.memory_space<semaphore_mem>>
    %11 = tpu.memref_squeeze %10 : memref<1x!tpu.dma_semaphore, #tpu.memory_space<semaphore_mem>> -> memref<!tpu.dma_semaphore, #tpu.memory_space<semaphore_mem>>
    tpu.wait_dma2 semaphore(%11 : memref<!tpu.dma_semaphore, #tpu.memory_space<semaphore_mem>>) src(%8 : memref<8x128xf32, #tpu.memory_space<any>>) dst(%9 : memref<8x128xf32, #tpu.memory_space<any>>)
    %c1_i32_12 = arith.constant 1 : i32
    %c8_i32_13 = arith.constant 8 : i32
    %c0_i32_14 = arith.constant 0 : i32
    %12 = tpu.memref_slice %arg0[%c8_i32_13, %c0_i32_14] : memref<16x128xf32, #tpu.memory_space<any>> -> memref<8x128xf32, #tpu.memory_space<any>>
    %c8_i32_15 = arith.constant 8 : i32
    %c0_i32_16 = arith.constant 0 : i32
    %13 = tpu.memref_slice %arg1[%c8_i32_15, %c0_i32_16] : memref<16x128xf32, #tpu.memory_space<any>> -> memref<8x128xf32, #tpu.memory_space<any>>
    %14 = tpu.memref_slice %arg2[%c1_i32_12] : memref<2x!tpu.dma_semaphore, #tpu.memory_space<semaphore_mem>> -> memref<1x!tpu.dma_semaphore, #tpu.memory_space<semaphore_mem>>
    %15 = tpu.memref_squeeze %14 : memref<1x!tpu.dma_semaphore, #tpu.memory_space<semaphore_mem>> -> memref<!tpu.dma_semaphore, #tpu.memory_space<semaphore_mem>>
    tpu.wait_dma2 semaphore(%15 : memref<!tpu.dma_semaphore, #tpu.memory_space<semaphore_mem>>) src(%12 : memref<8x128xf32, #tpu.memory_space<any>>) dst(%13 : memref<8x128xf32, #tpu.memory_space<any>>)
    return
  }
}

</mosaic_0001>

<bundles_post_ra>
// kernel: tpu_custom_call.1
= control target key start
LH: loop header
LB: loop body
LE: loop exit
PB: predicated region body
PF: predicated region fallthrough
CT: control target
= control target key end

     0   :  { %s64_s9 = smov [#allocation2]   ;;  %s65_s10 = smov [#allocation3]   ;;  %s91_s0 = inlined_call_operand.hbm [shape: f32[16,128], index: 0, kind: input, shape index: {}]   ;;  %s92_s1 = inlined_call_operand.hbm [shape: f32[16,128], index: 1, kind: output, shape index: {}]  }
   0x1   :  { %s19_s8 = scalar_lea.hbm %s91_s0, 128  ;;  %s66_s11 = smov 0  }
   0x2   :  { %18 = dma.general %s91_s0, 128, %s92_s1, %s64_s9, %s65_s10, [#allocation4], %s66_s11, 0  }
   0x3   :  { %s20_s18 = scalar_lea.hbm %s92_s1, 128  ;;  %s67_s19 = smov [#allocation2 + $0x1]  }
   0x4   :  { %s68_s20 = smov [#allocation5]  }
   0x5   :  { %34 = dma.general %s19_s8, 128, %s20_s18, %s67_s19, %s68_s20, [#allocation6], %s66_s11, 0  }
   0x6   :  { %60 = dma.done.wait [#allocation2], 128 }
   0x7   :  { %61 = vsyncadd [#allocation2], 4294967168 }
   0x8   :  { %62 = dma.done.wait [#allocation2 + $0x1], 128 }
   0x9   :  { %63 = vsyncadd [#allocation2 + $0x1], 4294967168 }
   0xa   :  { %40 = vsyncmov [#allocation2] }
   0xd   :  { %s41_s21 = vpop.sfrf %40 }
   0xe   :  { %p53_p0 = scmp.ne.s32.totalorder %s41_s21, 0 }
  0x10   :  { %45 = shalt.err (%p53_p0)  }
  0x11   :  { %47 = vsyncmov [#allocation2 + $0x1] }
  0x14   :  { %s48_s22 = vpop.sfrf %47 }
  0x15   :  { %p54_p1 = scmp.ne.s32.totalorder %s48_s22, 0 }
  0x17   :  { %52 = shalt.err (%p54_p1)  }

</bundles_post_ra>
